<compile_context>
chip_gen: v7x
topology: tpu7x:2x2x1
jax: 0.10.0
libtpu: 0.0.40
codegen_flags: <defaults>
</compile_context>

<pallas_src>
import jax
import jax.numpy as jnp
from jax.experimental import pallas as pl
from jax.experimental.pallas import tpu as pltpu


def _identity_dma_kernel(ts_hbm, out_hbm, sem):
    # Whole-array direct HBM -> HBM copy. No VMEM staging, no compute units
    # touched; the DMA engine moves the bytes at raw HBM bandwidth.
    cp = pltpu.make_async_copy(ts_hbm, out_hbm, sem)
    cp.start()
    cp.wait()


def base_model_forward(time_series: jax.Array, node_feature: jax.Array) -> jax.Array:
    """Pallas implementation of BaseModel.forward (abstract => identity on time_series).

    node_feature is accepted to honor the (time_series, node_feature) interface
    but, since forward() is abstract, contributes nothing to the output.
    """
    del node_feature  # unused: abstract forward defines no use of it
    return pl.pallas_call(
        _identity_dma_kernel,
        out_shape=jax.ShapeDtypeStruct(time_series.shape, time_series.dtype),
        # Leave both operands in HBM (pl.ANY): no BlockSpec tiling, no auto
        # pipelining, no VMEM footprint — the kernel issues one DMA itself.
        in_specs=[pl.BlockSpec(memory_space=pl.ANY)],
        out_specs=pl.BlockSpec(memory_space=pl.ANY),
        scratch_shapes=[pltpu.SemaphoreType.DMA],
    )(time_series)


if __name__ == "__main__":
    key = jax.random.PRNGKey(0)
    k1, k2 = jax.random.split(key)

    # Small shapes consistent with the (time_series, node_feature) interface.
    time_series = jax.random.normal(k1, (2, 8, 32), dtype=jnp.float32)    # (B, T, D)
    node_feature = jax.random.normal(k2, (2, 16, 32), dtype=jnp.float32)  # (B, N, D)

    out = base_model_forward(time_series, node_feature)
    out = jax.block_until_ready(out)

    # Sanity check: identity semantics of the abstract (no-op) forward.
    assert out.shape == time_series.shape
    assert out.dtype == time_series.dtype
    assert jnp.allclose(out, time_series)

    print("KERNEL_OK")
</pallas_src>

<mosaic_0001>
module attributes {stable_mosaic.version = 11 : i64} {
  func.func @_identity_dma_kernel(%arg0: memref<2x8x32xf32, #tpu.memory_space<any>>, %arg1: memref<2x8x32xf32, #tpu.memory_space<any>>, %arg2: memref<!tpu.dma_semaphore, #tpu.memory_space<semaphore_mem>>) attributes {dimension_semantics = [], scalar_prefetch = 0 : i64, scratch_operands = 1 : i64, tpu.core_type = #tpu.core_type<tc>} {
    tpu.enqueue_dma source(%arg0 : memref<2x8x32xf32, #tpu.memory_space<any>>) target(%arg1 : memref<2x8x32xf32, #tpu.memory_space<any>>) target_semaphore(%arg2 : memref<!tpu.dma_semaphore, #tpu.memory_space<semaphore_mem>>)
    tpu.wait_dma2 semaphore(%arg2 : memref<!tpu.dma_semaphore, #tpu.memory_space<semaphore_mem>>) src(%arg0 : memref<2x8x32xf32, #tpu.memory_space<any>>) dst(%arg1 : memref<2x8x32xf32, #tpu.memory_space<any>>)
    return
  }
}

</mosaic_0001>

<bundles_post_ra>
// kernel: tpu_custom_call.1
= control target key start
LH: loop header
LB: loop body
LE: loop exit
PB: predicated region body
PF: predicated region fallthrough
CT: control target
= control target key end

     0   :  { %s35_s6 = smov [#allocation2]   ;;  %s36_s7 = smov [#allocation3]   ;;  %s54_s0 = inlined_call_operand.hbm [shape: f32[2,8,32], index: 0, kind: input, shape index: {}]   ;;  %s55_s1 = inlined_call_operand.hbm [shape: f32[2,8,32], index: 1, kind: output, shape index: {}]  }
   0x1   :  { %s37_s8 = smov 0  }
   0x2   :  { %18 = dma.general %s54_s0, 256, %s55_s1, %s35_s6, %s36_s7, [#allocation4], %s37_s8, 0  }
   0x3   :  { %33 = dma.done.wait [#allocation2], 256 }
   0x4   :  { %34 = vsyncadd [#allocation2], 4294967040 }
   0x5   :  { %23 = vsyncmov [#allocation2] }
   0x8   :  { %s24_s13 = vpop.sfrf %23 }
   0x9   :  { %p29_p0 = scmp.ne.s32.totalorder %s24_s13, 0 }
   0xb   :  { %28 = shalt.err (%p29_p0)  }

</bundles_post_ra>
